<compile_context>
chip_gen: v5e
topology: v5e:2x2
jax: 0.10.0
libtpu: 0.0.40
codegen_flags: <defaults>
</compile_context>

<pallas_src>
import math

import jax
import jax.numpy as jnp
from jax.experimental import pallas as pl
from jax.experimental.pallas import tpu as pltpu


def _add_kernel(x_ref, h_ref, o_ref):
    # Pure elementwise add on the current VMEM tile (VPU op, mem-bound).
    o_ref[...] = x_ref[...] + h_ref[...]


_LANE_CANDIDATES = (4096, 2048, 1024, 512, 256, 128)


def _sublane(dtype):
    """Native sublane packing for the dtype (rows per vreg)."""
    isz = jnp.dtype(dtype).itemsize
    if isz >= 4:
        return 8
    if isz == 2:
        return 16
    return 32


def _round_up(x, m):
    return ((x + m - 1) // m) * m


def _vmem_budget():
    """(target_tile_bytes, vmem_limit_bytes), generation-aware, safe fallback."""
    target = 4 * 1024 * 1024     # v7x-safe: 3 arrays x 2 buffers x 4 MiB = 24 MiB
    limit = 48 * 1024 * 1024
    try:
        info = pltpu.get_tpu_info()
        vmem = getattr(info, "vmem_capacity_bytes", None)
        if vmem is not None and vmem >= 96 * 1024 * 1024:
            # 128 MiB-VMEM parts (v5e / v6e): bigger tiles, raised scoped limit
            # (mandatory on v5e whose scoped default is only 16 MiB).
            target = 8 * 1024 * 1024
            limit = 96 * 1024 * 1024
    except Exception:
        pass
    return target, limit


def _dense_layout(total, sublane):
    """total % 128 == 0: flat (rows, lane) view, lane a multiple of 128.

    Prefers the largest lane that still leaves at least `sublane` rows so
    vregs are fully packed in both directions.
    """
    for cand in _LANE_CANDIDATES:
        if total % cand == 0 and total // cand >= sublane:
            return total // cand, cand
    # Tiny array (< sublane*128 elements): single small block, lane = 128.
    return total // 128, 128


def _irregular_layout(shape, itemsize, sublane, target_tile_bytes):
    """total % 128 != 0: collapse adjacent original dims to a 2-D (R, C) view.

    The trailing block dim must equal C (full-dim exception), so pick the
    split point that maximizes vreg packing while a sublane-group of rows
    still fits the tile budget.  No padding, no extra HBM passes.
    """
    ndim = len(shape)
    best = None
    for k in range(1, ndim):
        r = math.prod(shape[:k])
        c = math.prod(shape[k:])
        if c * itemsize * sublane > target_tile_bytes:
            continue
        lane_util = c / float(_round_up(c, 128))
        sub_util = 1.0 if r >= sublane else r / float(sublane)
        score = lane_util * sub_util
        if best is None or score > best[0]:
            best = (score, r, c)
    if best is None:
        # Degenerate / 1-D case: keep the last dim as the lane axis.
        if ndim > 1:
            return math.prod(shape[:-1]), shape[-1]
        return 1, shape[0]
    return best[1], best[2]


def _tile_grid(rows, row_bytes, sublane, target_tile_bytes):
    """Pick (tile_rows, grid_steps).

    tile_rows is either a multiple of `sublane` or equals the full row extent
    (both legal block shapes); the last grid block may be partial — Pallas
    pads OOB loads and masks OOB stores, which is safe for elementwise ops.
    """
    max_rows = max(sublane, (target_tile_bytes // max(row_bytes, 1)) // sublane * sublane)
    if rows <= max_rows:
        tile_rows, steps = rows, 1
    else:
        tile_rows = max_rows
        steps = pl.cdiv(rows, tile_rows)

    # Megacore / pipelining: if the data is big but the natural grid is short,
    # use ~8 even steps so each v7x TensorCore gets a pipelined sub-grid with
    # prefetch(i+1)/writeback(i-1) overlap (neutral on single-TC v5e/v6e).
    total_bytes = rows * row_bytes
    if steps < 8 and total_bytes >= 4 * 1024 * 1024 and rows >= 8 * sublane:
        tile_rows = max(sublane, _round_up(pl.cdiv(rows, 8), sublane))
        steps = pl.cdiv(rows, tile_rows)
    return tile_rows, steps


def conv_gru_cell_simple_forward(input_tensor, h_cur, *, donate_h_cur=False):
    """h_next = input_tensor + h_cur, computed in a Pallas kernel.

    Args:
      input_tensor: (b, c, h, w) array (NCHW, same as PyTorch).
      h_cur:        (b, c_hidden, h, w) array; c_hidden == c.
      donate_h_cur: alias h_cur's buffer to the output (only safe if the
        caller never reads h_cur after this call, e.g. a time-scan rollout).
    Returns:
      h_next with the same shape/dtype as input_tensor.
    """
    assert input_tensor.shape == h_cur.shape, "input_dim must equal hidden_dim"
    assert input_tensor.dtype == h_cur.dtype
    orig_shape = input_tensor.shape
    dtype = input_tensor.dtype

    if len(orig_shape) == 0:
        return input_tensor + h_cur  # scalar degenerate case

    itemsize = jnp.dtype(dtype).itemsize
    sublane = _sublane(dtype)
    total = math.prod(orig_shape)
    target_tile_bytes, vmem_limit = _vmem_budget()

    if total % 128 == 0:
        rows, cols = _dense_layout(total, sublane)
    else:
        rows, cols = _irregular_layout(orig_shape, itemsize, sublane, target_tile_bytes)

    # Contiguous row-major collapse: free (no data movement), no padding.
    x2 = input_tensor.reshape(rows, cols)
    h2 = h_cur.reshape(rows, cols)

    row_bytes = cols * itemsize
    tile_rows, grid_steps = _tile_grid(rows, row_bytes, sublane, target_tile_bytes)

    spec = pl.BlockSpec((tile_rows, cols), lambda i: (i, 0))

    out2 = pl.pallas_call(
        _add_kernel,
        out_shape=jax.ShapeDtypeStruct((rows, cols), dtype),
        grid_spec=pltpu.PrefetchScalarGridSpec(
            num_scalar_prefetch=0,
            grid=(grid_steps,),
            in_specs=[spec, spec],
            out_specs=spec,
        ),
        compiler_params=pltpu.CompilerParams(
            dimension_semantics=("parallel",),
            vmem_limit_bytes=vmem_limit,
        ),
        input_output_aliases=({1: 0} if donate_h_cur else {}),
    )(x2, h2)

    return out2.reshape(orig_shape)


class ConvGRUCellSimpleJAX:
    """JAX/Pallas port of ConvGRUCellSimple (cell_type == 'simple')."""

    def __init__(self, input_size, input_dim, hidden_dim, kernel_size, bias,
                 dtype, cell_type):
        assert cell_type == "simple"
        self.height, self.width = input_size
        assert input_dim == hidden_dim
        self.hidden_dim = hidden_dim
        self.bias = bias
        self.dtype = dtype
        # No parameters in this cell — nothing to initialize.

    def init_hidden(self, batch_size):
        return jnp.zeros(
            (batch_size, self.hidden_dim, self.height, self.width),
            dtype=self.dtype,
        )

    def forward(self, input_tensor, h_cur, *, donate_h_cur=False):
        # Pass donate_h_cur=True inside a rollout/scan where h_cur is dead
        # after the call, to alias h_cur -> h_next and cut allocator churn.
        return conv_gru_cell_simple_forward(
            input_tensor, h_cur, donate_h_cur=donate_h_cur)

    __call__ = forward


if __name__ == "__main__":
    key = jax.random.PRNGKey(0)
    k1, k2 = jax.random.split(key)

    # Nominal module shapes (batch=2, channels=4, 16x16 spatial).
    B, C, H, W = 2, 4, 16, 16
    cell = ConvGRUCellSimpleJAX(
        input_size=(H, W),
        input_dim=C,
        hidden_dim=C,
        kernel_size=(3, 3),
        bias=True,
        dtype=jnp.float32,
        cell_type="simple",
    )

    x = jax.random.normal(k1, (B, C, H, W), dtype=jnp.float32)
    h0 = jax.random.normal(k2, (B, C, H, W), dtype=jnp.float32)

    h_next = cell(x, h0)
    jax.block_until_ready(h_next)
    assert h_next.shape == (B, C, H, W)
    assert h_next.dtype == x.dtype
    assert jnp.allclose(h_next, x + h0, atol=0, rtol=0)

    # Irregular shape (total not a multiple of 128): exercises the no-pad
    # full-trailing-dim path.
    B2, C2, H2, W2 = 3, 5, 17, 19
    x2 = jax.random.normal(k1, (B2, C2, H2, W2), dtype=jnp.float32)
    h2 = jax.random.normal(k2, (B2, C2, H2, W2), dtype=jnp.float32)
    out2 = conv_gru_cell_simple_forward(x2, h2)
    jax.block_until_ready(out2)
    assert jnp.allclose(out2, x2 + h2, atol=0, rtol=0)

    # Larger shape: exercises the multi-step grid / even-step split path.
    x3 = jax.random.normal(k1, (8, 64, 64, 64), dtype=jnp.float32)
    h3 = jax.random.normal(k2, (8, 64, 64, 64), dtype=jnp.float32)
    out3 = conv_gru_cell_simple_forward(x3, h3)
    jax.block_until_ready(out3)
    assert jnp.allclose(out3, x3 + h3, atol=0, rtol=0)

    # bf16: exercises the dtype-aware (16-row sublane) tiling path.
    xb = jax.random.normal(k1, (B, C, H, W), dtype=jnp.bfloat16)
    hb = jax.random.normal(k2, (B, C, H, W), dtype=jnp.bfloat16)
    outb = conv_gru_cell_simple_forward(xb, hb)
    jax.block_until_ready(outb)
    assert outb.dtype == jnp.bfloat16
    assert jnp.allclose(outb.astype(jnp.float32), (xb + hb).astype(jnp.float32),
                        atol=1e-2, rtol=1e-2)

    print("KERNEL_OK")
</pallas_src>

<mosaic_0001>
module attributes {stable_mosaic.version = 11 : i64} {
  func.func @_add_kernel(%arg0: i32, %arg1: memref<8x256xf32, #tpu.memory_space<vmem>>, %arg2: memref<8x256xf32, #tpu.memory_space<vmem>>, %arg3: memref<8x256xf32, #tpu.memory_space<vmem>>) attributes {dimension_semantics = [#tpu.dimension_semantics<parallel>], iteration_bounds = array<i64: 1>, scalar_prefetch = 0 : i64, scratch_operands = 0 : i64, tpu.core_type = #tpu.core_type<tc>, window_params = [{transform_indices = @transform_0, window_bounds = array<i64: 8, 256>}, {transform_indices = @transform_1, window_bounds = array<i64: 8, 256>}, {transform_indices = @transform_2, window_bounds = array<i64: 8, 256>}]} {
    %c0 = arith.constant 0 : index
    %c0_0 = arith.constant 0 : index
    %0 = vector.load %arg1[%c0, %c0_0] : memref<8x256xf32, #tpu.memory_space<vmem>>, vector<8x256xf32>
    %c0_1 = arith.constant 0 : index
    %c0_2 = arith.constant 0 : index
    %1 = vector.load %arg2[%c0_1, %c0_2] : memref<8x256xf32, #tpu.memory_space<vmem>>, vector<8x256xf32>
    %2 = arith.addf %0, %1 : vector<8x256xf32>
    %c0_3 = arith.constant 0 : index
    %c0_4 = arith.constant 0 : index
    %3 = vector.load %arg3[%c0_3, %c0_4] : memref<8x256xf32, #tpu.memory_space<vmem>>, vector<8x256xf32>
    tpu.vector_store %arg3[%c0_3, %c0_4], %2 {strides = array<i32>} : memref<8x256xf32, #tpu.memory_space<vmem>>, vector<8x256xf32>,
    return
  }
  func.func @transform_0(%arg0: i32) -> (i32, i32) {
    %c0_i32 = arith.constant 0 : i32
    %c0_i32_0 = arith.constant 0 : i32
    return %arg0, %c0_i32 : i32, i32
  }
  func.func @transform_1(%arg0: i32) -> (i32, i32) {
    %c0_i32 = arith.constant 0 : i32
    %c0_i32_0 = arith.constant 0 : i32
    return %arg0, %c0_i32 : i32, i32
  }
  func.func @transform_2(%arg0: i32) -> (i32, i32) {
    %c0_i32 = arith.constant 0 : i32
    %c0_i32_0 = arith.constant 0 : i32
    return %arg0, %c0_i32 : i32, i32
  }
}

</mosaic_0001>

<bundles_post_ra>
// kernel: tpu_custom_call.1
= control target key start
LH: loop header
LB: loop body
LE: loop exit
PB: predicated region body
PF: predicated region fallthrough
CT: control target
= control target key end

     0   :  { %7 = vsyncpa [#allocation3], 0  ;;  %s174_s0 = inlined_call_operand.hbm [shape: f32[8,256], index: 0, kind: input, shape index: {}]   ;;  %s175_s1 = inlined_call_operand.hbm [shape: f32[8,256], index: 1, kind: input, shape index: {}]   ;;  %s176_s2 = inlined_call_operand.hbm [shape: f32[8,256], index: 2, kind: output, shape index: {}]  }
   0x1   :  { %8 = vsyncpa [#allocation6], 0 }
   0x2   :  { %9 = vsyncpa [#allocation4], 0  ;;  %s15_s11 = sshll.u32 %s174_s0, 4  ;;  %s147_s12 = smov [#allocation2]   ;;  %s16_s11 = int_to_ptr.hbm [resolvable:$true] %s15_s11 }
   0x3   :  { %s17_s13 = sshll.u32 %s147_s12, 4  ;;  %s26_s16 = sshll.u32 %s175_s1, 4  ;;  %s18_s13 = int_to_ptr.vmem [resolvable:$true] %s17_s13  ;;  %s27_s16 = int_to_ptr.hbm [resolvable:$true] %s26_s16 }
   0x4   :  { %20 = dma.hbm_to_vmem [thread:$0]  %s16_s11, 256, %s18_s13, [#allocation3]  }
   0x5   :  { %s148_s17 = smov [#allocation5]  }
   0x6   :  { %s28_s18 = sshll.u32 %s148_s17, 4  ;;  %s29_s18 = int_to_ptr.vmem [resolvable:$true] %s28_s18 }
   0x7   :  { %31 = dma.hbm_to_vmem [thread:$0]  %s27_s16, 256, %s29_s18, [#allocation6]  }
   0x8   :  { %141 = dma.done.wait [#allocation3], 256  }
   0x9   :  { %142 = vsyncadd [#allocation3], 4294967040 }
   0xa   :  { %143 = dma.done.wait [#allocation6], 256  }
   0xb   :  { %144 = vsyncadd [#allocation6], 4294967040  ;;  %s149_s19 = smov [#allocation7]   ;;  %s55_s22 = sshll.u32 %s176_s2, 4  ;;  %v40_v0 = vld [vmem:[#allocation2] sm:$0xff]  ;;  %v42_v1 = vld [vmem:[#allocation5] sm:$0xff]  ;;  %s56_s22 = int_to_ptr.hbm [resolvable:$true] %s55_s22 }
   0xc   :  { %s53_s0 = sshll.u32 %s149_s19, 4  ;;  %v41_v2 = vld [vmem:[#allocation2 + $0x8] sm:$0xff]  ;;  %v44_v3 = vadd.f32 %v42_v1, %v40_v0  ;;  %v43_v4 = vld [vmem:[#allocation5 + $0x8] sm:$0xff]  ;;  %s54_s0 = int_to_ptr.vmem [resolvable:$true] %s53_s0 }
   0xd   :  { %v45_v5 = vadd.f32 %v43_v4, %v41_v2 }
   0xe   :  { %46 = vst [vmem:[#allocation7] sm:$0xff] %v44_v3 }
   0xf   :  { %47 = vst [vmem:[#allocation7 + $0x8] sm:$0xff] %v45_v5 }
  0x10   :  { %58 = dma.vmem_to_hbm [thread:$0]  %s54_s0, 256, %s56_s22, [#allocation4]  }
  0x11   :  { %145 = dma.done.wait [#allocation4], 256  }
  0x12   :  { %146 = vsyncadd [#allocation4], 4294967040 }
  0x13   :  { %63 = vsyncpa [#allocation3], 1 }
  0x14   :  { %64 = vsyncpa [#allocation6], 1 }
  0x15   :  { %65 = vsyncpa [#allocation4], 1 }

</bundles_post_ra>
